<compile_context>
chip_gen: v7x
topology: tpu7x:2x2x1
jax: 0.10.0
libtpu: 0.0.40
codegen_flags: <defaults>
</compile_context>

<pallas_src>
import jax
import jax.numpy as jnp
import numpy as np
from jax.experimental import pallas as pl
from jax.experimental.pallas import tpu as pltpu


# ----------------------------- Pallas kernel ------------------------------ #
def _make_cpam_dec_kernel(nb):
    """Decoder kernel over a block of `nb` batch elements (nb is static)."""

    def kernel(x_ref, ykc_ref, ycf_ref, a_ref, u_ref, wv_ref, bv_ref, out_ref):
        # x_ref  : (nb, C, HW) f32      ykc_ref: (nb, K, C) bf16
        # ycf_ref: (nb, C, K)  bf16     a_ref  : (C, C) bf16  == Wk^T Wq
        # u_ref  : (C, 1) f32  == Wk^T bq
        # wv_ref : (C, C) bf16 == scale*Wv      bv_ref: (C, 1) f32 == scale*bv
        for n in range(nb):  # static unroll; nb in {1, N}
            x32 = x_ref[n]                                     # (C, HW) f32
            xbf = x32.astype(jnp.bfloat16)

            # G = (Wk^T Wq) @ x + Wk^T bq   -> (C, HW), contraction over C
            g = jnp.dot(a_ref[...], xbf,
                        preferred_element_type=jnp.float32) + u_ref[...]

            # energy^T = y_kc @ G           -> (K, HW); energy terms constant
            # along K cancel in softmax(K) and are dropped (exact).
            e = jnp.dot(ykc_ref[n], g.astype(jnp.bfloat16),
                        preferred_element_type=jnp.float32)

            # softmax over K (axis 0); normalize AFTER the value matmul so the
            # divide becomes a (1, HW) EUP reciprocal + a cheap (C, HW) scale.
            e = e - jnp.max(e, axis=0, keepdims=True)
            p = jnp.exp(e)                                     # (K, HW)
            inv = pl.reciprocal(jnp.sum(p, axis=0, keepdims=True), approx=True)

            # value path ("scale" already folded into Wv / bv in the wrapper)
            v = jnp.dot(wv_ref[...], ycf_ref[n],
                        preferred_element_type=jnp.float32) + bv_ref[...]   # (C, K)
            o = jnp.dot(v.astype(jnp.bfloat16), p.astype(jnp.bfloat16),
                        preferred_element_type=jnp.float32)                 # (C, HW)

            out_ref[n] = o * inv + x32                         # residual in f32

    return kernel


def _collapse_batch_grid():
    """True on single-TensorCore chips (batch grid = pure per-step overhead);
    False on v7x where a parallel batch grid shards across the 2 TCs."""
    try:
        kind = jax.devices()[0].device_kind.lower()
    except Exception:
        return False
    return not ("v7" in kind or "7x" in kind)


def cpam_dec_pallas(x_cf, y_cf, y_kc, dec_params, *, collapse_batch=None):
    # x_cf: (N, C, HW) f32, y_cf: (N, C, K), y_kc: (N, K, C)
    N, C, HW = x_cf.shape
    K = y_cf.shape[2]
    f32 = jnp.float32

    wq = dec_params["wq"].astype(f32)        # (C4, C)
    bq = dec_params["bq"].astype(f32)        # (C4,)
    wk = dec_params["wk"].astype(f32)        # (C4, C)
    wv = dec_params["wv"].astype(f32)        # (C, C)
    bv = dec_params["bv"].astype(f32)        # (C,)
    scale = dec_params["scale"].astype(f32)[0]

    # Weight-only precompute (tiny, one-time):
    #   energy = (Wq x + bq)^T (Wk y + bk)
    #          = x^T (Wq^T Wk) y + bq^T Wk y + [terms constant along K]
    a = wk.T @ wq                            # (C, C)  -> G = A @ x + u
    u = (wk.T @ bq).reshape(C, 1)            # (C, 1)
    wv_s = scale * wv                        # fold residual scale into values
    bv_s = (scale * bv).reshape(C, 1)

    a_bf = a.astype(jnp.bfloat16)
    wv_bf = wv_s.astype(jnp.bfloat16)
    y_cf_bf = y_cf.astype(jnp.bfloat16)
    y_kc_bf = y_kc.astype(jnp.bfloat16)

    if collapse_batch is None:
        collapse_batch = _collapse_batch_grid()
    nb = N if collapse_batch else 1
    grid = (N // nb,)
    sem = ("arbitrary",) if collapse_batch else ("parallel",)

    # TODO(synk): for production DRAN sizes (C~512, HW>=4096) add an HW tile
    # axis to the grid and set vmem_limit_bytes (v7x has only 64 MiB VMEM).
    return pl.pallas_call(
        _make_cpam_dec_kernel(nb),
        out_shape=jax.ShapeDtypeStruct((N, C, HW), jnp.float32),
        grid_spec=pltpu.PrefetchScalarGridSpec(
            num_scalar_prefetch=0,
            grid=grid,
            in_specs=[
                pl.BlockSpec((nb, C, HW), lambda i: (i, 0, 0)),   # x   (f32)
                pl.BlockSpec((nb, K, C), lambda i: (i, 0, 0)),    # y_kc (bf16)
                pl.BlockSpec((nb, C, K), lambda i: (i, 0, 0)),    # y_cf (bf16)
                pl.BlockSpec((C, C), lambda i: (0, 0)),           # A    (bf16)
                pl.BlockSpec((C, 1), lambda i: (0, 0)),           # u    (f32)
                pl.BlockSpec((C, C), lambda i: (0, 0)),           # s*Wv (bf16)
                pl.BlockSpec((C, 1), lambda i: (0, 0)),           # s*bv (f32)
            ],
            out_specs=pl.BlockSpec((nb, C, HW), lambda i: (i, 0, 0)),
        ),
        compiler_params=pltpu.CompilerParams(dimension_semantics=sem),
    )(x_cf, y_kc_bf, y_cf_bf, a_bf, u, wv_bf, bv_s)


# ------------------------------ encoder glue ------------------------------- #
def _fold_bn(w, b, gamma, beta, mean, var, eps=1e-5):
    inv = gamma / jnp.sqrt(var + eps)
    return w * inv[:, None], (b - mean) * inv + beta


def cpam_enc(x, enc_params):
    """Returns gathering centers directly in decoder orientation (N, K, C)."""
    N, C, H, W = x.shape
    # Hierarchical adaptive-avg pooling: pool to 8x8 once, then 4/2/1 by
    # repeated 2x2 averaging (one pass over x instead of four).
    # TODO(synk): assumes H, W divisible by 8 (uniform adaptive-pool bins).
    p8 = x.reshape(N, C, 8, H // 8, 8, W // 8).mean(axis=(3, 5))     # (N,C,8,8)
    p4 = p8.reshape(N, C, 4, 2, 4, 2).mean(axis=(3, 5))
    p2 = p4.reshape(N, C, 2, 2, 2, 2).mean(axis=(3, 5))
    p1 = p2.mean(axis=(2, 3), keepdims=True)
    feats = []
    for pooled, br in zip((p1, p2, p4, p8), enc_params):
        w, b = _fold_bn(br["w"], br["b"], br["gamma"], br["beta"],
                        br["mean"], br["var"])
        p = pooled.shape[2]
        f = jnp.einsum("ncpq,dc->npqd", pooled, w).reshape(N, p * p, C) + b
        feats.append(jnp.maximum(f, 0.0))
    return jnp.concatenate(feats, axis=1)                            # (N, K, C)


@jax.jit
def dran_forward(x, params):
    N, C, H, W = x.shape
    y_kc = cpam_enc(x, params["enc"])                 # (N, K, C) == enc.permute(0,2,1)
    y_cf = jnp.transpose(y_kc, (0, 2, 1))             # (N, C, K)  (tiny: K=85)
    x_cf = x.reshape(N, C, H * W)                     # channels-first, no transpose
    dec_cf = cpam_dec_pallas(x_cf, y_cf, y_kc, params["dec"])
    dec_out = dec_cf.reshape(N, C, H, W)
    # DRAN.forward returns x (the decoder result is computed but discarded).
    return x, dec_out


# ------------------------- deterministic init ------------------------------ #
def init_params(key, C):
    C4 = C // 4
    ks = jax.random.split(key, 16)
    enc = []
    for i in range(4):
        enc.append(dict(
            w=0.05 * jax.random.normal(ks[i], (C, C), jnp.float32),
            b=0.01 * jax.random.normal(ks[4 + i], (C,), jnp.float32),
            gamma=jnp.ones((C,), jnp.float32),
            beta=jnp.zeros((C,), jnp.float32),
            mean=jnp.zeros((C,), jnp.float32),
            var=jnp.ones((C,), jnp.float32),
        ))
    dec = dict(
        wq=0.05 * jax.random.normal(ks[8], (C4, C), jnp.float32),
        bq=0.01 * jax.random.normal(ks[9], (C4,), jnp.float32),
        wk=0.05 * jax.random.normal(ks[10], (C4, C), jnp.float32),
        bk=0.01 * jax.random.normal(ks[11], (C4,), jnp.float32),
        wv=0.05 * jax.random.normal(ks[12], (C, C), jnp.float32),
        bv=0.01 * jax.random.normal(ks[13], (C,), jnp.float32),
        scale=jnp.zeros((1,), jnp.float32),   # matches nn.Parameter(torch.zeros(1))
    )
    return dict(enc=enc, dec=dec)


# --------------------------- pure-JAX reference ---------------------------- #
def cpam_dec_ref(x_cf, y_kc, dec):
    # Full original math (all bias terms, f32) on channels-first tensors.
    q = jnp.einsum("dc,nch->ndh", dec["wq"], x_cf) + dec["bq"][None, :, None]
    k = jnp.einsum("nkc,dc->nkd", y_kc, dec["wk"]) + dec["bk"]
    v = jnp.einsum("nkc,dc->nkd", y_kc, dec["wv"]) + dec["bv"]
    energy = jnp.einsum("ndh,nkd->nhk", q, k)
    attn = jax.nn.softmax(energy, axis=-1)
    out = jnp.einsum("nkc,nhk->nch", v, attn)
    return dec["scale"][0] * out + x_cf


# --------------------------------- main ------------------------------------ #
if __name__ == "__main__":
    N, C, H, W = 2, 32, 16, 16
    key = jax.random.PRNGKey(0)
    kx, kp = jax.random.split(key)
    x = jax.random.normal(kx, (N, C, H, W), jnp.float32)
    params = init_params(kp, C)

    # Module-faithful forward (DRAN returns its input x).
    out_x, dec_out = dran_forward(x, params)
    jax.block_until_ready((out_x, dec_out))
    np.testing.assert_allclose(np.asarray(out_x), np.asarray(x), rtol=0, atol=0)

    # Numerical check of the Pallas decoder against the pure-JAX f32 reference
    # (nonzero scale so the attention path matters; bf16 matmuls -> 2e-2 tol).
    test_dec = dict(params["dec"])
    test_dec["scale"] = jnp.array([0.5], jnp.float32)
    y_kc = cpam_enc(x, params["enc"])
    y_cf = jnp.transpose(y_kc, (0, 2, 1))
    x_cf = x.reshape(N, C, H * W)
    got = jax.block_until_ready(cpam_dec_pallas(x_cf, y_cf, y_kc, test_dec))
    want = cpam_dec_ref(x_cf, y_kc, test_dec)
    np.testing.assert_allclose(np.asarray(got), np.asarray(want),
                               rtol=2e-2, atol=2e-2)

    # Also exercise both grid variants explicitly (collapsed vs batch-parallel).
    got2 = jax.block_until_ready(
        cpam_dec_pallas(x_cf, y_cf, y_kc, test_dec, collapse_batch=True))
    got3 = jax.block_until_ready(
        cpam_dec_pallas(x_cf, y_cf, y_kc, test_dec, collapse_batch=False))
    np.testing.assert_allclose(np.asarray(got2), np.asarray(want), rtol=2e-2, atol=2e-2)
    np.testing.assert_allclose(np.asarray(got3), np.asarray(want), rtol=2e-2, atol=2e-2)

    print("KERNEL_OK")
</pallas_src>

<mosaic_0001>
module attributes {stable_mosaic.version = 11 : i64} {
  func.func @kernel(%arg0: i32, %arg1: memref<2x32x256xf32, #tpu.memory_space<vmem>>, %arg2: memref<2x85x32xbf16, #tpu.memory_space<vmem>>, %arg3: memref<2x32x85xbf16, #tpu.memory_space<vmem>>, %arg4: memref<32x32xbf16, #tpu.memory_space<vmem>>, %arg5: memref<32x1xf32, #tpu.memory_space<vmem>>, %arg6: memref<32x32xbf16, #tpu.memory_space<vmem>>, %arg7: memref<32x1xf32, #tpu.memory_space<vmem>>, %arg8: memref<2x32x256xf32, #tpu.memory_space<vmem>>) attributes {dimension_semantics = [#tpu.dimension_semantics<arbitrary>], iteration_bounds = array<i64: 1>, scalar_prefetch = 0 : i64, scratch_operands = 0 : i64, tpu.core_type = #tpu.core_type<tc>, window_params = [{transform_indices = @transform_0, window_bounds = array<i64: 2, 32, 256>}, {transform_indices = @transform_1, window_bounds = array<i64: 2, 85, 32>}, {transform_indices = @transform_2, window_bounds = array<i64: 2, 32, 85>}, {pipeline_mode = #tpu.pipeline_mode<synchronous>, transform_indices = @transform_3, window_bounds = array<i64: 32, 32>}, {pipeline_mode = #tpu.pipeline_mode<synchronous>, transform_indices = @transform_4, window_bounds = array<i64: 32, 1>}, {pipeline_mode = #tpu.pipeline_mode<synchronous>, transform_indices = @transform_5, window_bounds = array<i64: 32, 32>}, {pipeline_mode = #tpu.pipeline_mode<synchronous>, transform_indices = @transform_6, window_bounds = array<i64: 32, 1>}, {transform_indices = @transform_7, window_bounds = array<i64: 2, 32, 256>}]} {
    %c0 = arith.constant 0 : index
    %c0_0 = arith.constant 0 : index
    %c0_1 = arith.constant 0 : index
    %0 = vector.load %arg1[%c0, %c0_0, %c0_1] : memref<2x32x256xf32, #tpu.memory_space<vmem>>, vector<1x32x256xf32>
    %1 = vector.shape_cast %0 : vector<1x32x256xf32> to vector<32x256xf32>
    %2 = arith.truncf %1 : vector<32x256xf32> to vector<32x256xbf16>
    %c0_2 = arith.constant 0 : index
    %c0_3 = arith.constant 0 : index
    %3 = vector.load %arg4[%c0_2, %c0_3] : memref<32x32xbf16, #tpu.memory_space<vmem>>, vector<32x32xbf16>
    %cst = arith.constant dense<0.000000e+00> : vector<32x256xf32>
    %4 = tpu.matmul %3, %2, %cst {dimension_numbers = #tpu.dot_dimension_numbers<[1], [0], [0], [1], [0, 0, 1, 1], [], []>} : vector<32x32xbf16>, vector<32x256xbf16>, vector<32x256xf32> -> vector<32x256xf32>
    %c0_4 = arith.constant 0 : index
    %c0_5 = arith.constant 0 : index
    %5 = vector.load %arg5[%c0_4, %c0_5] : memref<32x1xf32, #tpu.memory_space<vmem>>, vector<32x1xf32>
    %6 = vector.broadcast %5 : vector<32x1xf32> to vector<32x256xf32>
    %7 = arith.addf %4, %6 : vector<32x256xf32>
    %c0_6 = arith.constant 0 : index
    %c0_7 = arith.constant 0 : index
    %c0_8 = arith.constant 0 : index
    %8 = vector.load %arg2[%c0_6, %c0_7, %c0_8] : memref<2x85x32xbf16, #tpu.memory_space<vmem>>, vector<1x85x32xbf16>
    %9 = vector.shape_cast %8 : vector<1x85x32xbf16> to vector<85x32xbf16>
    %10 = arith.truncf %7 : vector<32x256xf32> to vector<32x256xbf16>
    %cst_9 = arith.constant dense<0.000000e+00> : vector<85x256xf32>
    %11 = tpu.matmul %9, %10, %cst_9 {dimension_numbers = #tpu.dot_dimension_numbers<[1], [0], [0], [1], [0, 0, 1, 1], [], []>} : vector<85x32xbf16>, vector<32x256xbf16>, vector<85x256xf32> -> vector<85x256xf32>
    %cst_10 = arith.constant dense<0xFF800000> : vector<256xf32>
    %12 = vector.multi_reduction <maximumf>, %11, %cst_10 [0] : vector<85x256xf32> to vector<256xf32>
    %13 = vector.shape_cast %12 : vector<256xf32> to vector<1x256xf32>
    %14 = vector.broadcast %13 : vector<1x256xf32> to vector<85x256xf32>
    %15 = arith.subf %11, %14 : vector<85x256xf32>
    %16 = math.exp %15 : vector<85x256xf32>
    %cst_11 = arith.constant dense<0.000000e+00> : vector<256xf32>
    %17 = vector.multi_reduction <add>, %16, %cst_11 [0] : vector<85x256xf32> to vector<256xf32>
    %18 = vector.shape_cast %17 : vector<256xf32> to vector<1x256xf32>
    %19 = tpu.reciprocal %18 {approx = true} : vector<1x256xf32> -> vector<1x256xf32>
    %c0_12 = arith.constant 0 : index
    %c0_13 = arith.constant 0 : index
    %20 = vector.load %arg6[%c0_12, %c0_13] : memref<32x32xbf16, #tpu.memory_space<vmem>>, vector<32x32xbf16>
    %c0_14 = arith.constant 0 : index
    %c0_15 = arith.constant 0 : index
    %c0_16 = arith.constant 0 : index
    %21 = vector.load %arg3[%c0_14, %c0_15, %c0_16] : memref<2x32x85xbf16, #tpu.memory_space<vmem>>, vector<1x32x85xbf16>
    %22 = vector.shape_cast %21 : vector<1x32x85xbf16> to vector<32x85xbf16>
    %cst_17 = arith.constant dense<0.000000e+00> : vector<32x85xf32>
    %23 = tpu.matmul %20, %22, %cst_17 {dimension_numbers = #tpu.dot_dimension_numbers<[1], [0], [0], [1], [0, 0, 1, 1], [], []>} : vector<32x32xbf16>, vector<32x85xbf16>, vector<32x85xf32> -> vector<32x85xf32>
    %c0_18 = arith.constant 0 : index
    %c0_19 = arith.constant 0 : index
    %24 = vector.load %arg7[%c0_18, %c0_19] : memref<32x1xf32, #tpu.memory_space<vmem>>, vector<32x1xf32>
    %25 = vector.broadcast %24 : vector<32x1xf32> to vector<32x85xf32>
    %26 = arith.addf %23, %25 : vector<32x85xf32>
    %27 = arith.truncf %26 : vector<32x85xf32> to vector<32x85xbf16>
    %28 = arith.truncf %16 : vector<85x256xf32> to vector<85x256xbf16>
    %cst_20 = arith.constant dense<0.000000e+00> : vector<32x256xf32>
    %29 = tpu.matmul %27, %28, %cst_20 {dimension_numbers = #tpu.dot_dimension_numbers<[1], [0], [0], [1], [0, 0, 1, 1], [], []>} : vector<32x85xbf16>, vector<85x256xbf16>, vector<32x256xf32> -> vector<32x256xf32>
    %30 = vector.broadcast %19 : vector<1x256xf32> to vector<32x256xf32>
    %31 = arith.mulf %29, %30 : vector<32x256xf32>
    %32 = arith.addf %31, %1 : vector<32x256xf32>
    %c0_21 = arith.constant 0 : index
    %c0_22 = arith.constant 0 : index
    %c0_23 = arith.constant 0 : index
    %33 = vector.load %arg8[%c0_21, %c0_22, %c0_23] : memref<2x32x256xf32, #tpu.memory_space<vmem>>, vector<1x32x256xf32>
    %34 = vector.shape_cast %33 : vector<1x32x256xf32> to vector<32x256xf32>
    %35 = vector.shape_cast %32 : vector<32x256xf32> to vector<1x32x256xf32>
    tpu.vector_store %arg8[%c0_21, %c0_22, %c0_23], %35 {strides = array<i32>} : memref<2x32x256xf32, #tpu.memory_space<vmem>>, vector<1x32x256xf32>,
    %c1 = arith.constant 1 : index
    %c0_24 = arith.constant 0 : index
    %c0_25 = arith.constant 0 : index
    %36 = vector.load %arg1[%c1, %c0_24, %c0_25] : memref<2x32x256xf32, #tpu.memory_space<vmem>>, vector<1x32x256xf32>
    %37 = vector.shape_cast %36 : vector<1x32x256xf32> to vector<32x256xf32>
    %38 = arith.truncf %37 : vector<32x256xf32> to vector<32x256xbf16>
    %c0_26 = arith.constant 0 : index
    %c0_27 = arith.constant 0 : index
    %39 = vector.load %arg4[%c0_26, %c0_27] : memref<32x32xbf16, #tpu.memory_space<vmem>>, vector<32x32xbf16>
    %cst_28 = arith.constant dense<0.000000e+00> : vector<32x256xf32>
    %40 = tpu.matmul %39, %38, %cst_28 {dimension_numbers = #tpu.dot_dimension_numbers<[1], [0], [0], [1], [0, 0, 1, 1], [], []>} : vector<32x32xbf16>, vector<32x256xbf16>, vector<32x256xf32> -> vector<32x256xf32>
    %c0_29 = arith.constant 0 : index
    %c0_30 = arith.constant 0 : index
    %41 = vector.load %arg5[%c0_29, %c0_30] : memref<32x1xf32, #tpu.memory_space<vmem>>, vector<32x1xf32>
    %42 = vector.broadcast %41 : vector<32x1xf32> to vector<32x256xf32>
    %43 = arith.addf %40, %42 : vector<32x256xf32>
    %c1_31 = arith.constant 1 : index
    %c0_32 = arith.constant 0 : index
    %c0_33 = arith.constant 0 : index
    %44 = vector.load %arg2[%c1_31, %c0_32, %c0_33] : memref<2x85x32xbf16, #tpu.memory_space<vmem>>, vector<1x85x32xbf16>
    %45 = vector.shape_cast %44 : vector<1x85x32xbf16> to vector<85x32xbf16>
    %46 = arith.truncf %43 : vector<32x256xf32> to vector<32x256xbf16>
    %cst_34 = arith.constant dense<0.000000e+00> : vector<85x256xf32>
    %47 = tpu.matmul %45, %46, %cst_34 {dimension_numbers = #tpu.dot_dimension_numbers<[1], [0], [0], [1], [0, 0, 1, 1], [], []>} : vector<85x32xbf16>, vector<32x256xbf16>, vector<85x256xf32> -> vector<85x256xf32>
    %cst_35 = arith.constant dense<0xFF800000> : vector<256xf32>
    %48 = vector.multi_reduction <maximumf>, %47, %cst_35 [0] : vector<85x256xf32> to vector<256xf32>
    %49 = vector.shape_cast %48 : vector<256xf32> to vector<1x256xf32>
    %50 = vector.broadcast %49 : vector<1x256xf32> to vector<85x256xf32>
    %51 = arith.subf %47, %50 : vector<85x256xf32>
    %52 = math.exp %51 : vector<85x256xf32>
    %cst_36 = arith.constant dense<0.000000e+00> : vector<256xf32>
    %53 = vector.multi_reduction <add>, %52, %cst_36 [0] : vector<85x256xf32> to vector<256xf32>
    %54 = vector.shape_cast %53 : vector<256xf32> to vector<1x256xf32>
    %55 = tpu.reciprocal %54 {approx = true} : vector<1x256xf32> -> vector<1x256xf32>
    %c0_37 = arith.constant 0 : index
    %c0_38 = arith.constant 0 : index
    %56 = vector.load %arg6[%c0_37, %c0_38] : memref<32x32xbf16, #tpu.memory_space<vmem>>, vector<32x32xbf16>
    %c1_39 = arith.constant 1 : index
    %c0_40 = arith.constant 0 : index
    %c0_41 = arith.constant 0 : index
    %57 = vector.load %arg3[%c1_39, %c0_40, %c0_41] : memref<2x32x85xbf16, #tpu.memory_space<vmem>>, vector<1x32x85xbf16>
    %58 = vector.shape_cast %57 : vector<1x32x85xbf16> to vector<32x85xbf16>
    %cst_42 = arith.constant dense<0.000000e+00> : vector<32x85xf32>
    %59 = tpu.matmul %56, %58, %cst_42 {dimension_numbers = #tpu.dot_dimension_numbers<[1], [0], [0], [1], [0, 0, 1, 1], [], []>} : vector<32x32xbf16>, vector<32x85xbf16>, vector<32x85xf32> -> vector<32x85xf32>
    %c0_43 = arith.constant 0 : index
    %c0_44 = arith.constant 0 : index
    %60 = vector.load %arg7[%c0_43, %c0_44] : memref<32x1xf32, #tpu.memory_space<vmem>>, vector<32x1xf32>
    %61 = vector.broadcast %60 : vector<32x1xf32> to vector<32x85xf32>
    %62 = arith.addf %59, %61 : vector<32x85xf32>
    %63 = arith.truncf %62 : vector<32x85xf32> to vector<32x85xbf16>
    %64 = arith.truncf %52 : vector<85x256xf32> to vector<85x256xbf16>
    %cst_45 = arith.constant dense<0.000000e+00> : vector<32x256xf32>
    %65 = tpu.matmul %63, %64, %cst_45 {dimension_numbers = #tpu.dot_dimension_numbers<[1], [0], [0], [1], [0, 0, 1, 1], [], []>} : vector<32x85xbf16>, vector<85x256xbf16>, vector<32x256xf32> -> vector<32x256xf32>
    %66 = vector.broadcast %55 : vector<1x256xf32> to vector<32x256xf32>
    %67 = arith.mulf %65, %66 : vector<32x256xf32>
    %68 = arith.addf %67, %37 : vector<32x256xf32>
    %c1_46 = arith.constant 1 : index
    %c0_47 = arith.constant 0 : index
    %c0_48 = arith.constant 0 : index
    %69 = vector.load %arg8[%c1_46, %c0_47, %c0_48] : memref<2x32x256xf32, #tpu.memory_space<vmem>>, vector<1x32x256xf32>
    %70 = vector.shape_cast %69 : vector<1x32x256xf32> to vector<32x256xf32>
    %71 = vector.shape_cast %68 : vector<32x256xf32> to vector<1x32x256xf32>
    tpu.vector_store %arg8[%c1_46, %c0_47, %c0_48], %71 {strides = array<i32>} : memref<2x32x256xf32, #tpu.memory_space<vmem>>, vector<1x32x256xf32>,
    return
  }
  func.func @transform_0(%arg0: i32) -> (i32, i32, i32) {
    %c0_i32 = arith.constant 0 : i32
    %c0_i32_0 = arith.constant 0 : i32
    %c0_i32_1 = arith.constant 0 : i32
    return %arg0, %c0_i32, %c0_i32_0 : i32, i32, i32
  }
  func.func @transform_1(%arg0: i32) -> (i32, i32, i32) {
    %c0_i32 = arith.constant 0 : i32
    %c0_i32_0 = arith.constant 0 : i32
    %c0_i32_1 = arith.constant 0 : i32
    return %arg0, %c0_i32, %c0_i32_0 : i32, i32, i32
  }
  func.func @transform_2(%arg0: i32) -> (i32, i32, i32) {
    %c0_i32 = arith.constant 0 : i32
    %c0_i32_0 = arith.constant 0 : i32
    %c0_i32_1 = arith.constant 0 : i32
    return %arg0, %c0_i32, %c0_i32_0 : i32, i32, i32
  }
  func.func @transform_3(%arg0: i32) -> (i32, i32) {
    %c0_i32 = arith.constant 0 : i32
    %c0_i32_0 = arith.constant 0 : i32
    %c0_i32_1 = arith.constant 0 : i32
    return %c0_i32, %c0_i32_0 : i32, i32
  }
  func.func @transform_4(%arg0: i32) -> (i32, i32) {
    %c0_i32 = arith.constant 0 : i32
    %c0_i32_0 = arith.constant 0 : i32
    %c0_i32_1 = arith.constant 0 : i32
    return %c0_i32, %c0_i32_0 : i32, i32
  }
  func.func @transform_5(%arg0: i32) -> (i32, i32) {
    %c0_i32 = arith.constant 0 : i32
    %c0_i32_0 = arith.constant 0 : i32
    %c0_i32_1 = arith.constant 0 : i32
    return %c0_i32, %c0_i32_0 : i32, i32
  }
  func.func @transform_6(%arg0: i32) -> (i32, i32) {
    %c0_i32 = arith.constant 0 : i32
    %c0_i32_0 = arith.constant 0 : i32
    %c0_i32_1 = arith.constant 0 : i32
    return %c0_i32, %c0_i32_0 : i32, i32
  }
  func.func @transform_7(%arg0: i32) -> (i32, i32, i32) {
    %c0_i32 = arith.constant 0 : i32
    %c0_i32_0 = arith.constant 0 : i32
    %c0_i32_1 = arith.constant 0 : i32
    return %arg0, %c0_i32, %c0_i32_0 : i32, i32, i32
  }
}

</mosaic_0001>

<bundles_post_ra>
// kernel: dran_forward.1
= control target key start
LH: loop header
LB: loop body
LE: loop exit
PB: predicated region body
PF: predicated region fallthrough
CT: control target
= control target key end

     0   :  { %v1495_v3 = vmov 0   ;;  %vm77_vm0 = vcmask 261120   ;;  %vm297_vm1 = vcmask 1044480   ;;  %vm556_vm2 = vcmask 1041408   ;;  %s2099_s0 = inlined_call_operand.vmem [shape: f32[2,32,256], index: 0, kind: input, shape index: {}]   ;;  %s2100_s3 = inlined_call_operand.vmem [shape: bf16[32,32], index: 3, kind: input, shape index: {}]   ;;  %s2101_s2 = inlined_call_operand.vmem [shape: bf16[2,32,85], index: 2, kind: input, shape index: {}]   ;;  %s2102_s5 = inlined_call_operand.vmem [shape: bf16[32,32], index: 5, kind: input, shape index: {}]   ;;  %s2103_s4 = inlined_call_operand.vmem [shape: f32[32,1], index: 4, kind: input, shape index: {}]   ;;  %s2104_s6 = inlined_call_operand.vmem [shape: f32[32,1], index: 6, kind: input, shape index: {}]   ;;  %s2105_s1 = inlined_call_operand.vmem [shape: bf16[2,85,32], index: 1, kind: input, shape index: {}]   ;;  %s2106_s7 = inlined_call_operand.vmem [shape: f32[2,32,256], index: 7, kind: output, shape index: {}]  }
   0x1   :  { %v1540_v0 = vld [vmem:[%s2099_s0 + $0x8] sm:$0xff]  ;;  %v1545_v1 = vld [vmem:[%s2099_s0 + $0x18] sm:$0xff]  ;;  %v1550_v2 = vld [vmem:[%s2099_s0] sm:$0xff]  ;;  %116 = vmatprep.mubr.bf16.mxu0 %v1495_v3  ;;  %1365 = vset.pattern.permute.xlu0 %v1495_v3  ;;  %vm557_vm3 = vcmask 1042432   ;;  %vm549_vm4 = vcmask 695296  }
   0x2   :  { %v36_v4 = vpack.c.bf16 %v1545_v1, %v1540_v0  ;;  %v1559_v5 = vld [vmem:[%s2099_s0 + $0x10] sm:$0xff]  ;;  %v1564_v6 = vld [vmem:[%s2099_s0 + $0x28] sm:$0xff]  ;;  %v1569_v7 = vld [vmem:[%s2099_s0 + $0x38] sm:$0xff]  ;;  %1366 = vset.pattern.permute.xlu1 %v1495_v3  ;;  %230 = vmatprep.mubr.bf16.mxu1 %v1495_v3 }
   0x3   :  { %v35_v8 = vpack.c.bf16 %v1559_v5, %v1550_v2  ;;  %v38_v9 = vpack.c.bf16 %v1569_v7, %v1564_v6  ;;  %v1580_v10 = vld [vmem:[%s2099_s0 + $0x20] sm:$0xff]  ;;  %v1585_v11 = vld [vmem:[%s2099_s0 + $0x30] sm:$0xff]  ;;  %v1370_v16 = vld [vmem:[%s2101_s2 + $0x8] sm:$0xff]  }
   0x4   :  { %84 = vmatprep.subr.bf16.mxu0 %v36_v4  ;;  %v37_v12 = vpack.c.bf16 %v1585_v11, %v1580_v10  ;;  %v1369_v13 = vld [vmem:[%s2101_s2] sm:$0xff]   ;;  %v45_v17 = vld [vmem:[%s2103_s4 + $0x10] sm:$0xff]  ;;  %v44_v18 = vld [vmem:[%s2103_s4 + $0x8] sm:$0xff] }
   0x5   :  { %85 = vmatpush1.bf16.msra.mxu0 %v35_v8  ;;  %v1367_v14 = vld [vmem:[%s2100_s3] sm:$0xff]   ;;  %59 = vperm.xlu1 %1366, %v45_v17   ;;  %v46_v19 = vld [vmem:[%s2103_s4 + $0x18] sm:$0xff]  ;;  %v1368_v21 = vld [vmem:[%s2100_s3 + $0x8] sm:$0xff]  }
   0x6   :  { %86 = vmatprep.subr.bf16.mxu0 %v38_v9  ;;  %v43_v15 = vld [vmem:[%s2103_s4] sm:$0xff]  ;;  %v435_v22 = vld [vmem:[%s2104_s6 + $0x8] sm:$0xff]  ;;  %v436_v24 = vld [vmem:[%s2104_s6 + $0x10] sm:$0xff] }
   0x7   :  { %49 = vperm.xlu0 %1365, %v43_v15   ;;  %v434_v20 = vld [vmem:[%s2104_s6] sm:$0xff]  ;;  %v437_v25 = vld [vmem:[%s2104_s6 + $0x18] sm:$0xff]  ;;  %v1372_v26 = vld [vmem:[%s2102_s5 + $0x8] sm:$0xff]  }
   0x8   :  { %v1371_v23 = vld [vmem:[%s2102_s5] sm:$0xff]   ;;  %v1285_v48 = vld [vmem:[%s2099_s0 + $0x48] sm:$0xff]  ;;  %v1287_v49 = vld [vmem:[%s2099_s0 + $0x58] sm:$0xff] }
   0x9   :  { %87 = vmatpush1.bf16.msra.mxu0 %v37_v12  ;;  %64 = vperm.xlu1 %1366, %v46_v19   ;;  %v653_v55 = vpack.c.bf16 %v1287_v49, %v1285_v48  ;;  %v1284_v56 = vld [vmem:[%s2099_s0 + $0x40] sm:$0xff]  ;;  %v1286_v57 = vld [vmem:[%s2099_s0 + $0x50] sm:$0xff]  ;;  %v1289_v58 = vld [vmem:[%s2099_s0 + $0x68] sm:$0xff] }
   0xa   :  { %1347 = vmatprep.subr.bf16.mxu0 %v1369_v13  ;;  %v1291_v59 = vld [vmem:[%s2099_s0 + $0x78] sm:$0xff]  ;;  %v1373_v61 = vld [vmem:[%s2105_s1] sm:$0xff]   ;;  %v652_v4 = vpack.c.bf16 %v1286_v57, %v1284_v56 }
   0xb   :  { %54 = vperm.xlu0 %1365, %v44_v18   ;;  %v655_v12 = vpack.c.bf16 %v1291_v59, %v1289_v58 }
   0xc   :  { %1262 = vmatmul.mubr.msk.bf16.vlgmr.msra.gmra.mrb[0].mxu0 %vm77_vm0, %v1367_v14  ;;  %v1290_v14 = vld [vmem:[%s2099_s0 + $0x70] sm:$0xff] }
   0xd   :  { %126 = vmatprep.mubr.bf16.mxu0 %v1495_v3  ;;  %1348 = vmatpush3.bf16.msra.mxu0 %v1369_v13  ;;  %v1288_v13 = vld [vmem:[%s2099_s0 + $0x60] sm:$0xff] }
   0xe   :  { %1349 = vmatprep.subr.bf16.mxu0 %v1370_v16  ;;  %445 = vperm.xlu1 %1366, %v435_v22  }
   0xf   :  { %440 = vperm.xlu0 %1365, %v434_v20  }
  0x11   :  { %1350 = vmatpush3.bf16.msra.mxu0 %v1370_v16 }
  0x12   :  { %455 = vperm.xlu1 %1366, %v437_v25  }
  0x13   :  { %450 = vperm.xlu0 %1365, %v436_v24  }
  0x14   :  { %1263 = vmatmul.mubr.msk.bf16.gmra.mrb[4].mxu0 %vm77_vm0, %v1368_v21  ;;  %v654_v21 = vpack.c.bf16 %v1290_v14, %v1288_v13 }
  0x15   :  { %1351 = vmatprep.mubr.msk.bf16.mxu0 %vm77_vm0, %v1371_v23  ;;  %v1381_v23 = vld [vmem:[%s2101_s2 + $0x10] sm:$0xff]  }
  0x16   :  { %671 = vperm.xlu1 %1366, %v44_v18  }
  0x17   :  { %666 = vperm.xlu0 %1365, %v43_v15  }
  0x1a   :  { %681 = vperm.xlu1 %1366, %v46_v19  }
  0x1b   :  { %676 = vperm.xlu0 %1365, %v45_v17  }
  0x1c   :  { %1352 = vmatmul.mubr.msk.bf16.vlgmr.msra.gmra.mrb[8].mxu0 %vm77_vm0, %v1372_v26  ;;  %v1376_v26 = vld [vmem:[%s2105_s1 + $0x18] sm:$0xff]  }
  0x1d   :  { %598 = vmatprep.mubr.bf16.mxu0 %v1495_v3 }
  0x1e   :  { %1062 = vperm.xlu1 %1366, %v435_v22  }
  0x1f   :  { %1057 = vperm.xlu0 %1365, %v434_v20  }
  0x22   :  { %1072 = vperm.xlu1 %1366, %v437_v25   ;;  %v1375_v25 = vld [vmem:[%s2105_s1 + $0x10] sm:$0xff]  }
  0x23   :  { %1067 = vperm.xlu0 %1365, %v436_v24   ;;  %v1374_v24 = vld [vmem:[%s2105_s1 + $0x8] sm:$0xff]  }
  0x84   :  { %v60_v28 = vpop.permute.xlu1 %59 }
  0x86   :  { %v50_v27 = vpop.permute.xlu0 %49 }
  0x88   :  { %v65_v39 = vpop.permute.xlu1 %64 }
  0x8a   :  { %v55_v31 = vpop.permute.xlu0 %54 }
  0x8d   :  { %v446_v50 = vpop.permute.xlu1 %445 }
  0x8e   :  { %v441_v44 = vpop.permute.xlu0 %440 }
  0x91   :  { %v456_v8 = vpop.permute.xlu1 %455 }
  0x92   :  { %v451_v62 = vpop.permute.xlu0 %450 }
  0xdf   :  { %v118_v29 = vpop.f32.mrb[0].mxu0 }
  0xe0   :  { %v120_v30 = vpop.f32.mrb[1].mxu0  ;;  %v119_v33 = vadd.f32 %v118_v29, %v50_v27  ;;  %v1379_v29 = vld [vmem:[%s2100_s3] sm:$0xff]  }
  0xe1   :  { %v122_v32 = vpop.f32.mrb[2].mxu0  ;;  %v121_v36 = vadd.f32 %v120_v30, %v50_v27  ;;  %v1377_v27 = vld [vmem:[%s2105_s1 + $0x20] sm:$0xff]   ;;  %v1382_v30 = vld [vmem:[%s2101_s2 + $0x18] sm:$0xff]  }
  0xe2   :  { %v123_v34 = vadd.f32 %v122_v32, %v55_v31  ;;  %v124_v35 = vpop.f32.mrb[3].mxu0  ;;  %v1383_v32 = vld [vmem:[%s2102_s5] sm:$0xff]  }
  0xe3   :  { %v125_v37 = vadd.f32 %v124_v35, %v55_v31  ;;  %v1380_v31 = vld [vmem:[%s2100_s3 + $0x8] sm:$0xff]  }
  0xe4   :  { %v148_v38 = vpack.c.bf16 %v123_v34, %v119_v33  ;;  %v1384_v33 = vld [vmem:[%s2102_s5 + $0x8] sm:$0xff]  }
  0xe5   :  { %v149_v40 = vpack.c.bf16 %v125_v37, %v121_v36 }
  0xe7   :  { %v128_v41 = vpop.f32.mrb[4].mxu0  ;;  %198 = vmatprep.subr.bf16.mxu1 %v149_v40 }
  0xe8   :  { %v130_v42 = vpop.f32.mrb[5].mxu0  ;;  %199 = vmatpush1.bf16.msra.mxu1 %v148_v38  ;;  %v129_v45 = vadd.f32 %v128_v41, %v60_v28 }
  0xe9   :  { %v132_v43 = vpop.f32.mrb[6].mxu0  ;;  %v131_v51 = vadd.f32 %v130_v42, %v60_v28  ;;  %v1378_v28 = vld [vmem:[%s2105_s1 + $0x28] ss:$0 sps:$4 sm:$0x77]  }
  0xea   :  { %v133_v46 = vadd.f32 %v132_v43, %v65_v39  ;;  %v134_v47 = vpop.f32.mrb[7].mxu0 }
  0xeb   :  { %v135_v52 = vadd.f32 %v134_v47, %v65_v39 }
  0xec   :  { %v150_v53 = vpack.c.bf16 %v133_v46, %v129_v45 }
  0xed   :  { %v151_v54 = vpack.c.bf16 %v135_v52, %v131_v51 }
  0xef   :  { %200 = vmatprep.subr.bf16.mxu1 %v151_v54  ;;  %v1353_v60 = vpop.f32.mrb[8].mxu0 }
  0xf0   :  { %201 = vmatpush1.bf16.msra.mxu1 %v150_v53  ;;  %v520_v63 = vpop.f32.mrb[9].mxu0  ;;  %v1664_v15 = vadd.f32 %v1353_v60, %v451_v62 }
  0xf1   :  { %v1354_v9 = vpop.f32.mrb[10].mxu0  ;;  %700 = vmatprep.subr.bf16.mxu1 %v653_v55  ;;  %v1668_v18 = vadd.f32 %v520_v63, %v441_v44 }
  0xf2   :  { %v1666_v16 = vadd.f32 %v1354_v9, %v456_v8  ;;  %v523_v17 = vpop.f32.mrb[11].mxu0 }
  0xf3   :  { %v1670_v19 = vadd.f32 %v523_v17, %v446_v50  ;;  %1270 = vmatmul.mubr.msk.bf16.vlgmr.msra.gmra.mrb[0].mxu1 %vm77_vm0, %v1373_v61 }
  0xf4   :  { %v536_v20 = vpack.c.bf16 %v1666_v16, %v1664_v15  ;;  %240 = vmatprep.mubr.bf16.mxu1 %v1495_v3  ;;  %701 = vmatpush1.bf16.msra.mxu1 %v652_v4  ;;  %v1387_v15 = vld [vmem:[%s2105_s1 + $0x3c] sm:$0xff]   ;;  %v1388_v16 = vld [vmem:[%s2105_s1 + $0x44] sm:$0xff]  }
  0xf5   :  { %v535_v22 = vpack.c.bf16 %v1670_v19, %v1668_v18  ;;  %702 = vmatprep.subr.bf16.mxu1 %v655_v12  ;;  %v1385_v18 = vld [vmem:[%s2105_s1 + $0x2c] sm:$0xff]   ;;  %v1386_v19 = vld [vmem:[%s2105_s1 + $0x34] sm:$0xff]  }
  0xf8   :  { %703 = vmatpush1.bf16.msra.mxu1 %v654_v21 }
  0xf9   :  { %1355 = vmatprep.subr.bf16.mxu1 %v1381_v23 }
  0xfb   :  { %1271 = vmatmul.mubr.msk.bf16.gmra.mrb[4].mxu1 %vm77_vm0, %v1374_v24 }
  0xfc   :  { %250 = vmatprep.mubr.bf16.mxu1 %v1495_v3 }
 0x103   :  { %1272 = vmatmul.mubr.msk.bf16.gmra.mrb[8].mxu1 %vm77_vm0, %v1375_v25 }
 0x104   :  { %260 = vmatprep.mubr.bf16.mxu1 %v1495_v3 }
 0x10b   :  { %1273 = vmatmul.mubr.msk.bf16.gmra.mrb[12].mxu1 %vm77_vm0, %v1376_v26 }
 0x10c   :  { %270 = vmatprep.mubr.bf16.mxu1 %v1495_v3 }
 0x113   :  { %1274 = vmatmul.mubr.msk.bf16.gmra.mrb[16].mxu1 %vm77_vm0, %v1377_v27 }
 0x114   :  { %280 = vmatprep.mubr.bf16.mxu1 %v1495_v3 }
 0x11b   :  { %1275 = vmatmul.mubr.msk.bf16.gmra.mrb[20].mxu1 %vm77_vm0, %v1378_v28 }
 0x11c   :  { %732 = vmatprep.mubr.bf16.mxu1 %v1495_v3 }
 0x123   :  { %1294 = vmatmul.mubr.msk.bf16.vlgmr.msra.gmra.mrb[24].mxu1 %vm77_vm0, %v1379_v29 }
 0x124   :  { %742 = vmatprep.mubr.bf16.mxu1 %v1495_v3  ;;  %1356 = vmatpush3.bf16.msra.mxu1 %v1381_v23 }
 0x125   :  { %1357 = vmatprep.subr.bf16.mxu1 %v1382_v30 }
 0x128   :  { %1358 = vmatpush3.bf16.msra.mxu1 %v1382_v30 }
 0x12b   :  { %1295 = vmatmul.mubr.msk.bf16.gmra.mrb[28].mxu1 %vm77_vm0, %v1380_v31 }
 0x12c   :  { %1359 = vmatprep.mubr.msk.bf16.mxu1 %vm77_vm0, %v1383_v32 }
 0x133   :  { %1360 = vmatmul.mubr.msk.bf16.vlgmr.msra.gmra.mrb[32].mxu1 %vm77_vm0, %v1384_v33 }
 0x134   :  { %1210 = vmatprep.mubr.bf16.mxu1 %v1495_v3 }
 0x1c6   :  { %v1727_v34 = vpop.f32.mrb[0].mxu1 }
 0x1c7   :  { %v1729_v35 = vpop.f32.mrb[1].mxu1 }
 0x1c8   :  { %v1731_v36 = vpop.f32.mrb[2].mxu1 }
 0x1c9   :  { %v1733_v37 = vpop.f32.mrb[3].mxu1 }
 0x1ce   :  { %v1735_v38 = vpop.f32.mrb[4].mxu1 }
 0x1cf   :  { %v289_v39 = vmax.f32 %v1727_v34, %v1735_v38  ;;  %v1739_v40 = vpop.f32.mrb[5].mxu1 }
 0x1d0   :  { %v307_v41 = vmax.f32 %v1729_v35, %v1739_v40  ;;  %v1743_v42 = vpop.f32.mrb[6].mxu1 }
 0x1d1   :  { %v290_v43 = vmax.f32 %v1731_v36, %v1743_v42  ;;  %v1747_v44 = vpop.f32.mrb[7].mxu1 }
 0x1d2   :  { %v308_v45 = vmax.f32 %v1733_v37, %v1747_v44 }
 0x1d6   :  { %v1751_v46 = vpop.f32.mrb[8].mxu1 }
 0x1d7   :  { %v291_v47 = vmax.f32 %v289_v39, %v1751_v46  ;;  %v1754_v48 = vpop.f32.mrb[9].mxu1 }
 0x1d8   :  { %v309_v49 = vmax.f32 %v307_v41, %v1754_v48  ;;  %v1757_v50 = vpop.f32.mrb[10].mxu1  ;;  %v667_v41 = vpop.permute.xlu0 %666 }
 0x1d9   :  { %v292_v51 = vmax.f32 %v290_v43, %v1757_v50  ;;  %v1760_v52 = vpop.f32.mrb[11].mxu1 }
 0x1da   :  { %v310_v53 = vmax.f32 %v308_v45, %v1760_v52 }
 0x1de   :  { %v1763_v54 = vpop.f32.mrb[12].mxu1 }
 0x1df   :  { %v293_v55 = vmax.f32 %v291_v47, %v1763_v54  ;;  %v1766_v56 = vpop.f32.mrb[13].mxu1  ;;  %v672_v47 = vpop.permute.xlu1 %671 }
 0x1e0   :  { %v311_v57 = vmax.f32 %v309_v49, %v1766_v56  ;;  %v1769_v58 = vpop.f32.mrb[14].mxu1 }
 0x1e1   :  { %v294_v59 = vmax.f32 %v292_v51, %v1769_v58  ;;  %v1772_v60 = vpop.f32.mrb[15].mxu1 }
 0x1e2   :  { %v312_v61 = vmax.f32 %v310_v53, %v1772_v60 }
 0x1e6   :  { %v1775_v62 = vpop.f32.mrb[16].mxu1 }
 0x1e7   :  { %v295_v63 = vmax.f32 %v293_v55, %v1775_v62  ;;  %v1778_v4 = vpop.f32.mrb[17].mxu1 }
 0x1e8   :  { %v313_v8 = vmax.f32 %v311_v57, %v1778_v4  ;;  %v1781_v9 = vpop.f32.mrb[18].mxu1 }
 0x1e9   :  { %v296_v12 = vmax.f32 %v294_v59, %v1781_v9  ;;  %v1784_v13 = vpop.f32.mrb[19].mxu1 }
 0x1ea   :  { %v314_v14 = vmax.f32 %v312_v61, %v1784_v13 }
 0x1ee   :  { %v1787_v17 = vpop.f32.mrb[20].mxu1 }
 0x1ef   :  { %v298_v21 = vsel %vm297_vm1, %v1787_v17, -inf  ;;  %v1791_v23 = vpop.f32.mrb[21].mxu1 }
 0x1f0   :  { %v299_v24 = vmax.f32 %v295_v63, %v298_v21  ;;  %v315_v25 = vsel %vm297_vm1, %v1791_v23, -inf  ;;  %v286_v26 = vpop.f32.mrb[22].mxu1 }
 0x1f1   :  { %v316_v27 = vmax.f32 %v313_v8, %v315_v25  ;;  %v287_v28 = vpop.f32.mrb[23].mxu1 }
 0x1f2   :  { %v300_v29 = vmax.f32 %v299_v24, %v296_v12 }
 0x1f3   :  { %v317_v30 = vmax.f32 %v316_v27, %v314_v14 }
 0x1f4   :  { %v301_v31 = vrot.slane %v300_v29, 4 }
 0x1f5   :  { %v318_v32 = vrot.slane %v317_v30, 4 }
 0x1f6   :  { %v302_v33 = vmax.f32 %v300_v29, %v301_v31  ;;  %v734_v39 = vpop.f32.mrb[24].mxu1 }
 0x1f7   :  { %v319_v43 = vmax.f32 %v317_v30, %v318_v32  ;;  %v736_v45 = vpop.f32.mrb[25].mxu1  ;;  %v1795_v55 = vadd.f32 %v734_v39, %v667_v41 }
 0x1f8   :  { %v303_v49 = vrot.slane %v302_v33, 2  ;;  %v738_v51 = vpop.f32.mrb[26].mxu1  ;;  %v1799_v63 = vadd.f32 %v736_v45, %v667_v41  ;;  %v677_v41 = vpop.permute.xlu0 %676 }
 0x1f9   :  { %v320_v53 = vrot.slane %v319_v43, 2  ;;  %v1797_v57 = vadd.f32 %v738_v51, %v672_v47  ;;  %v740_v59 = vpop.f32.mrb[27].mxu1 }
 0x1fa   :  { %v304_v61 = vmax.f32 %v302_v33, %v303_v49  ;;  %v1801_v8 = vadd.f32 %v740_v59, %v672_v47 }
 0x1fb   :  { %v321_v12 = vmax.f32 %v319_v43, %v320_v53  ;;  %v765_v14 = vpack.c.bf16 %v1797_v57, %v1795_v55  ;;  %v682_v53 = vpop.permute.xlu1 %681 }
 0x1fc   :  { %v305_v21 = vrot.slane %v304_v61, 1  ;;  %v766_v24 = vpack.c.bf16 %v1801_v8, %v1799_v63 }
 0x1fd   :  { %v322_v25 = vrot.slane %v321_v12, 1 }
 0x1fe   :  { %v306_v26 = vmax.f32 %v304_v61, %v305_v21  ;;  %v744_v27 = vpop.f32.mrb[28].mxu1 }
 0x1ff   :  { %v1807_v28 = vmax.f32 %v321_v12, %v322_v25  ;;  %v746_v29 = vpop.f32.mrb[29].mxu1 }
 0x200   :  { %v324_v30 = vsub.f32 %v1727_v34, %v306_v26  ;;  %v326_v31 = vsub.f32 %v1731_v36, %v306_v26  ;;  %v328_v32 = vsub.f32 %v1735_v38, %v306_v26  ;;  %v330_v33 = vsub.f32 %v1743_v42, %v306_v26  ;;  %v748_v39 = vpop.f32.mrb[30].mxu1 }
 0x201   :  { %v332_v43 = vsub.f32 %v1751_v46, %v306_v26  ;;  %v334_v45 = vsub.f32 %v1757_v50, %v306_v26  ;;  %v336_v47 = vsub.f32 %v1763_v54, %v306_v26  ;;  %v338_v49 = vsub.f32 %v1769_v58, %v306_v26  ;;  %v750_v51 = vpop.f32.mrb[31].mxu1 }
 0x202   :  { %v340_v34 = vsub.f32 %v1775_v62, %v306_v26  ;;  %v342_v36 = vsub.f32 %v1781_v9, %v306_v26  ;;  %v344_v38 = vsub.f32 %v1787_v17, %v306_v26  ;;  %v346_v59 = vmul.f32 1.442695, %v324_v30  ;;  %v1058_v26 = vpop.permute.xlu0 %1057 }
 0x203   :  { %v350_v42 = vmul.f32 1.442695, %v326_v31  ;;  %v354_v61 = vmul.f32 1.442695, %v328_v32  ;;  %v358_v12 = vmul.f32 1.442695, %v330_v33  ;;  %v325_v46 = vsub.f32 %v1729_v35, %v1807_v28  ;;  %v1063_v33 = vpop.permute.xlu1 %1062 }
 0x204   :  { %1391 = vpow2.f32 %v346_v59  ;;  %v362_v50 = vmul.f32 1.442695, %v332_v43  ;;  %v366_v54 = vmul.f32 1.442695, %v334_v45  ;;  %v370_v58 = vmul.f32 1.442695, %v336_v47 }
 0x205   :  { %1393 = vpow2.f32 %v350_v42  ;;  %v374_v21 = vmul.f32 1.442695, %v338_v49  ;;  %v378_v25 = vmul.f32 1.442695, %v340_v34  ;;  %v327_v62 = vsub.f32 %v1733_v37, %v1807_v28 }
 0x206   :  { %1395 = vpow2.f32 %v354_v61  ;;  %v329_v9 = vsub.f32 %v1739_v40, %v1807_v28  ;;  %v1361_v17 = vpop.f32.mrb[32].mxu1  ;;  %v331_v35 = vsub.f32 %v1747_v44, %v1807_v28  ;;  %v333_v30 = vsub.f32 %v1754_v48, %v1807_v28  ;;  %v1068_v61 = vpop.permute.xlu0 %1067 }
 0x207   :  { %1397 = vpow2.f32 %v358_v12  ;;  %v335_v31 = vsub.f32 %v1760_v52, %v1807_v28  ;;  %v1137_v32 = vpop.f32.mrb[33].mxu1  ;;  %v337_v37 = vsub.f32 %v1766_v56, %v1807_v28  ;;  %v339_v40 = vsub.f32 %v1772_v60, %v1807_v28 }
 0x208   :  { %1399 = vpow2.f32 %v362_v50  ;;  %v341_v43 = vsub.f32 %v1778_v4, %v1807_v28  ;;  %v1362_v45 = vpop.f32.mrb[34].mxu1  ;;  %v382_v44 = vmul.f32 1.442695, %v342_v36  ;;  %v343_v48 = vsub.f32 %v1784_v13, %v1807_v28 }
 0x209   :  { %1401 = vpow2.f32 %v366_v54  ;;  %v345_v52 = vsub.f32 %v1791_v23, %v1807_v28  ;;  %v1140_v47 = vpop.f32.mrb[35].mxu1  ;;  %v386_v49 = vmul.f32 1.442695, %v344_v38  ;;  %v348_v56 = vmul.f32 1.442695, %v325_v46  ;;  %v1073_v28 = vpop.permute.xlu1 %1072 }
 0x20a   :  { %1403 = vpow2.f32 %v370_v58  ;;  %v352_v34 = vmul.f32 1.442695, %v327_v62  ;;  %v1842_v59 = vadd.f32 %v744_v27, %v677_v41  ;;  %v356_v60 = vmul.f32 1.442695, %v329_v9 }
 0x20b   :  { %1405 = vpow2.f32 %v374_v21  ;;  %v360_v4 = vmul.f32 1.442695, %v331_v35  ;;  %v364_v42 = vmul.f32 1.442695, %v333_v30  ;;  %v368_v36 = vmul.f32 1.442695, %v335_v31 }
 0x20c   :  { %1407 = vpow2.f32 %v378_v25  ;;  %v1844_v12 = vadd.f32 %v746_v29, %v677_v41  ;;  %v1846_v13 = vadd.f32 %v748_v39, %v682_v53  ;;  %v1848_v38 = vadd.f32 %v750_v51, %v682_v53 }
 0x20d   :  { %1409 = vpow2.f32 %v382_v44  ;;  %v1850_v46 = vadd.f32 %v1361_v17, %v1068_v61  ;;  %v1852_v27 = vadd.f32 %v1137_v32, %v1058_v26  ;;  %v1856_v58 = vadd.f32 %v1362_v45, %v1073_v28 }
 0x20e   :  { %v1392_v23 = vpop.eup %1391  ;;  %1411 = vpow2.f32 %v386_v49  ;;  %v767_v54 = vpack.c.bf16 %v1846_v13, %v1842_v59  ;;  %v1858_v29 = vadd.f32 %v1140_v47, %v1063_v33  ;;  %v768_v51 = vpack.c.bf16 %v1848_v38, %v1844_v12 }
 0x20f   :  { %v1394_v50 = vpop.eup %1393  ;;  %1413 = vpow2.f32 %v348_v56  ;;  %v372_v25 = vmul.f32 1.442695, %v337_v37  ;;  %v1153_v62 = vpack.c.bf16 %v1856_v58, %v1850_v46  ;;  %v376_v35 = vmul.f32 1.442695, %v339_v40 }
 0x210   :  { %v1860_v39 = vpop.eup %1395  ;;  %v390_v41 = vadd.f32 %v1394_v50, %v1392_v23  ;;  %1415 = vpow2.f32 %v352_v34  ;;  %v537_v53 = vpack.c.bf16 %v1394_v50, %v1392_v23  ;;  %v1152_v9 = vpack.c.bf16 %v1858_v29, %v1852_v27 }
 0x211   :  { %v1398_v21 = vpop.eup %1397  ;;  %1417 = vpow2.f32 %v356_v60  ;;  %v380_v32 = vmul.f32 1.442695, %v341_v43  ;;  %v384_v37 = vmul.f32 1.442695, %v343_v48  ;;  %v388_v61 = vmul.f32 1.442695, %v345_v52 }
 0x212   :  { %v1400_v17 = vpop.eup %1399  ;;  %v391_v26 = vadd.f32 %v1860_v39, %v390_v41  ;;  %1419 = vpow2.f32 %v360_v4  ;;  %v539_v30 = vpack.c.bf16 %v1398_v21, %v1860_v39 }
 0x213   :  { %v1402_v31 = vpop.eup %1401  ;;  %1421 = vpow2.f32 %v364_v42 }
 0x214   :  { %v1404_v33 = vpop.eup %1403  ;;  %v392_v45 = vadd.f32 %v1398_v21, %v391_v26  ;;  %1423 = vpow2.f32 %v368_v36  ;;  %v541_v44 = vpack.c.bf16 %v1402_v31, %v1400_v17 }
 0x215   :  { %v1406_v47 = vpop.eup %1405  ;;  %1425 = vpow2.f32 %v372_v25 }
 0x216   :  { %v1408_v49 = vpop.eup %1407  ;;  %v393_v56 = vadd.f32 %v1400_v17, %v392_v45  ;;  %1427 = vpow2.f32 %v376_v35  ;;  %v543_v34 = vpack.c.bf16 %v1406_v47, %v1404_v33 }
 0x217   :  { %v1410_v60 = vpop.eup %1409  ;;  %1429 = vpow2.f32 %v380_v32 }
 0x218   :  { %v1412_v4 = vpop.eup %1411  ;;  %v394_v40 = vadd.f32 %v1402_v31, %v393_v56  ;;  %1431 = vpow2.f32 %v384_v37  ;;  %v545_v23 = vpack.c.bf16 %v1410_v60, %v1408_v49 }
 0x219   :  { %v1414_v42 = vpop.eup %1413  ;;  %1433 = vpow2.f32 %v388_v61  ;;  %v399_v56 = vsel %vm297_vm1, %v1412_v4, 0.0 }
 0x21a   :  { %v1416_v43 = vpop.eup %1415  ;;  %v395_v28 = vadd.f32 %v1404_v33, %v394_v40 }
 0x21b   :  { %v1418_v50 = vpop.eup %1417  ;;  %v407_v36 = vadd.f32 %v1416_v43, %v1414_v42  ;;  %v538_v48 = vpack.c.bf16 %v1416_v43, %v1414_v42 }
 0x21c   :  { %v1420_v39 = vpop.eup %1419  ;;  %v396_v41 = vadd.f32 %v1406_v47, %v395_v28 }
 0x21d   :  { %v1422_v21 = vpop.eup %1421  ;;  %v408_v25 = vadd.f32 %v1418_v50, %v407_v36  ;;  %566 = vmatprep.subr.bf16.mxu0 %v538_v48  ;;  %v540_v17 = vpack.c.bf16 %v1420_v39, %v1418_v50  ;;  %v1496_v36 = vmov 65535  }
 0x21e   :  { %v1424_v26 = vpop.eup %1423  ;;  %v397_v35 = vadd.f32 %v1408_v49, %v396_v41  ;;  %567 = vmatpush1.bf16.msra.mxu0 %v537_v53 }
 0x21f   :  { %v1426_v31 = vpop.eup %1425  ;;  %v409_v32 = vadd.f32 %v1420_v39, %v408_v25  ;;  %568 = vmatprep.subr.bf16.mxu0 %v540_v17  ;;  %v542_v52 = vpack.c.bf16 %v1424_v26, %v1422_v21  ;;  %v547_v25 = vpack.c.bf16 %v1412_v4, %v1412_v4 }
 0x220   :  { %v1428_v45 = vpop.eup %1427  ;;  %v398_v37 = vadd.f32 %v1410_v60, %v397_v35  ;;  %v558_v60 = vsel %vm556_vm2, 4294967295, %v1496_v36 }
 0x221   :  { %v1430_v33 = vpop.eup %1429  ;;  %v410_v40 = vadd.f32 %v1422_v21, %v409_v32  ;;  %v544_v42 = vpack.c.bf16 %v1428_v45, %v1426_v31  ;;  %v1871_v41 = vsel %vm557_vm3, %v558_v60, 0 }
 0x222   :  { %v1432_v47 = vpop.eup %1431  ;;  %v400_v61 = vadd.f32 %v399_v56, %v398_v37  ;;  %569 = vmatpush1.bf16.msra.mxu0 %v539_v30 }
 0x223   :  { %v411_v43 = vadd.f32 %v1424_v26, %v410_v40  ;;  %570 = vmatprep.subr.bf16.mxu0 %v542_v52  ;;  %v546_v28 = vpack.c.bf16 %v1432_v47, %v1430_v33  ;;  %v1434_v53 = vpop.eup %1433 }
 0x224   :  { %v548_v39 = vpack.c.bf16 %v1434_v53, %v1434_v53  ;;  %v416_v30 = vsel %vm297_vm1, %v1434_v53, 0.0  ;;  %v401_v55 = vrot.slane %v400_v61, 4 }
 0x225   :  { %v412_v49 = vadd.f32 %v1426_v31, %v411_v43 }
 0x226   :  { %571 = vmatpush1.bf16.msra.mxu0 %v541_v44  ;;  %v564_v26 = vand.u32 %v1871_v41, %v548_v39  ;;  %v561_v44 = vand.u32 %v1871_v41, %v547_v25  ;;  %v402_v63 = vadd.f32 %v401_v55, %v400_v61 }
 0x227   :  { %v413_v50 = vadd.f32 %v1428_v45, %v412_v49  ;;  %572 = vmatprep.subr.bf16.mxu0 %v544_v42 }
 0x229   :  { %v414_v48 = vadd.f32 %v1430_v33, %v413_v50 }
 0x22a   :  { %573 = vmatpush1.bf16.msra.mxu0 %v543_v34 }
 0x22b   :  { %v415_v21 = vadd.f32 %v1432_v47, %v414_v48  ;;  %574 = vmatprep.subr.bf16.mxu0 %v546_v28 }
 0x22d   :  { %v417_v17 = vadd.f32 %v416_v30, %v415_v21 }
 0x22e   :  { %575 = vmatpush1.bf16.msra.mxu0 %v545_v23 }
 0x22f   :  { %576 = vmatprep.subr.bf16.mxu0 %v564_v26  ;;  %v418_v57 = vrot.slane %v417_v17, 4 }
 0x231   :  { %v419_v8 = vadd.f32 %v418_v57, %v417_v17 }
 0x232   :  { %577 = vmatpush1.bf16.msra.mxu0 %v561_v44 }
 0x233   :  { %815 = vmatprep.subr.bf16.mxu0 %v766_v24  ;;  %v420_v24 = vrot.slane %v419_v8, 2 }
 0x235   :  { %1282 = vmatmul.mubr.msk.bf16.vlgmr.msra.gmra.mrb[12].mxu0 %vm549_vm4, %v535_v22  ;;  %v1390_v22 = vld [vmem:[%s2105_s1 + $0x54] ss:$0 sps:$4 sm:$0x77]   ;;  %v421_v12 = vadd.f32 %v420_v24, %v419_v8 }
 0x236   :  { %816 = vmatpush1.bf16.msra.mxu0 %v765_v14  ;;  %608 = vmatprep.mubr.bf16.mxu0 %v1495_v3  ;;  %v403_v14 = vrot.slane %v402_v63, 2 }
 0x237   :  { %817 = vmatprep.subr.bf16.mxu0 %v768_v51  ;;  %v422_v38 = vrot.slane %v421_v12, 1 }
 0x238   :  { %v404_v59 = vadd.f32 %v403_v14, %v402_v63 }
 0x239   :  { %v423_v51 = vadd.f32 %v422_v38, %v421_v12 }
 0x23a   :  { %818 = vmatpush1.bf16.msra.mxu0 %v767_v54  ;;  %v405_v13 = vrot.slane %v404_v59, 1 }
 0x23c   :  { %v406_v54 = vadd.f32 %v405_v13, %v404_v59 }
 0x23d   :  { %1283 = vmatmul.mubr.msk.bf16.gmra.mrb[16].mxu0 %vm549_vm4, %v536_v20  ;;  %v1389_v20 = vld [vmem:[%s2105_s1 + $0x4c] sm:$0xff]  }
 0x23e   :  { %847 = vmatprep.mubr.bf16.mxu0 %v1495_v3  ;;  %1435 = vrcp.f32 %v406_v54 }
 0x23f   :  { %1437 = vrcp.f32 %v423_v51 }
 0x245   :  { %1313 = vmatmul.mubr.msk.bf16.vlgmr.msra.gmra.mrb[20].mxu0 %vm77_vm0, %v1385_v18 }
 0x246   :  { %857 = vmatprep.mubr.bf16.mxu0 %v1495_v3 }
 0x248   :  { %v1436_v34 = vpop.eup %1435 }
 0x249   :  { %v1438_v23 = vpop.eup %1437 }
 0x24d   :  { %1314 = vmatmul.mubr.msk.bf16.gmra.mrb[24].mxu0 %vm77_vm0, %v1386_v19 }
 0x24e   :  { %867 = vmatprep.mubr.bf16.mxu0 %v1495_v3 }
 0x255   :  { %1315 = vmatmul.mubr.msk.bf16.gmra.mrb[28].mxu0 %vm77_vm0, %v1387_v15 }
 0x256   :  { %877 = vmatprep.mubr.bf16.mxu0 %v1495_v3 }
 0x25d   :  { %1316 = vmatmul.mubr.msk.bf16.gmra.mrb[32].mxu0 %vm77_vm0, %v1388_v16 }
 0x25e   :  { %887 = vmatprep.mubr.bf16.mxu0 %v1495_v3 }
 0x265   :  { %1317 = vmatmul.mubr.msk.bf16.gmra.mrb[36].mxu0 %vm77_vm0, %v1389_v20 }
 0x266   :  { %897 = vmatprep.mubr.bf16.mxu0 %v1495_v3 }
 0x26d   :  { %1318 = vmatmul.mubr.msk.bf16.gmra.mrb[40].mxu0 %vm77_vm0, %v1390_v22 }
 0x308   :  { %v600_v4 = vpop.f32.mrb[12].mxu0 }
 0x309   :  { %v619_v35 = vmul.f32 %v1436_v34, %v600_v4  ;;  %v602_v31 = vpop.f32.mrb[13].mxu0 }
 0x30a   :  { %v620_v32 = vmul.f32 %v1438_v23, %v602_v31  ;;  %v604_v52 = vpop.f32.mrb[14].mxu0 }
 0x30b   :  { %v627_v45 = vadd.f32 %v619_v35, %v1550_v2  ;;  %v621_v37 = vmul.f32 %v1436_v34, %v604_v52  ;;  %v606_v33 = vpop.f32.mrb[15].mxu0 }
 0x30c   :  { %v628_v56 = vadd.f32 %v620_v32, %v1540_v0  ;;  %v622_v40 = vmul.f32 %v1438_v23, %v606_v33 }
 0x30d   :  { %635 = vst [vmem:[%s2106_s7] sm:$0xff] %v627_v45  ;;  %v629_v42 = vadd.f32 %v621_v37, %v1559_v5 }
 0x30e   :  { %636 = vst [vmem:[%s2106_s7 + $0x8] sm:$0xff] %v628_v56  ;;  %v630_v47 = vadd.f32 %v622_v40, %v1545_v1 }
 0x30f   :  { %637 = vst [vmem:[%s2106_s7 + $0x10] sm:$0xff] %v629_v42 }
 0x310   :  { %638 = vst [vmem:[%s2106_s7 + $0x18] sm:$0xff] %v630_v47  ;;  %v610_v0 = vpop.f32.mrb[16].mxu0 }
 0x311   :  { %v623_v2 = vmul.f32 %v1436_v34, %v610_v0  ;;  %v612_v61 = vpop.f32.mrb[17].mxu0 }
 0x312   :  { %v624_v43 = vmul.f32 %v1438_v23, %v612_v61  ;;  %v614_v28 = vpop.f32.mrb[18].mxu0 }
 0x313   :  { %v631_v5 = vadd.f32 %v623_v2, %v1580_v10  ;;  %v625_v49 = vmul.f32 %v1436_v34, %v614_v28  ;;  %v616_v53 = vpop.f32.mrb[19].mxu0 }
 0x314   :  { %v632_v50 = vadd.f32 %v624_v43, %v1564_v6  ;;  %v626_v1 = vmul.f32 %v1438_v23, %v616_v53 }
 0x315   :  { %639 = vst [vmem:[%s2106_s7 + $0x20] sm:$0xff] %v631_v5  ;;  %v633_v36 = vadd.f32 %v625_v49, %v1585_v11 }
 0x316   :  { %640 = vst [vmem:[%s2106_s7 + $0x28] sm:$0xff] %v632_v50  ;;  %v634_v60 = vadd.f32 %v626_v1, %v1569_v7 }
 0x317   :  { %641 = vst [vmem:[%s2106_s7 + $0x30] sm:$0xff] %v633_v36 }
 0x318   :  { %642 = vst [vmem:[%s2106_s7 + $0x38] sm:$0xff] %v634_v60  ;;  %v1959_v6 = vpop.f32.mrb[20].mxu0 }
 0x319   :  { %v1961_v10 = vpop.f32.mrb[21].mxu0 }
 0x31a   :  { %v1963_v48 = vpop.f32.mrb[22].mxu0 }
 0x31b   :  { %v1965_v11 = vpop.f32.mrb[23].mxu0 }
 0x320   :  { %v1967_v39 = vpop.f32.mrb[24].mxu0 }
 0x321   :  { %v906_v7 = vmax.f32 %v1959_v6, %v1967_v39  ;;  %v1971_v21 = vpop.f32.mrb[25].mxu0 }
 0x322   :  { %v923_v30 = vmax.f32 %v1961_v10, %v1971_v21  ;;  %v1975_v25 = vpop.f32.mrb[26].mxu0 }
 0x323   :  { %v907_v17 = vmax.f32 %v1963_v48, %v1975_v25  ;;  %v1979_v26 = vpop.f32.mrb[27].mxu0 }
 0x324   :  { %v924_v44 = vmax.f32 %v1965_v11, %v1979_v26 }
 0x328   :  { %v1983_v18 = vpop.f32.mrb[28].mxu0 }
 0x329   :  { %v908_v19 = vmax.f32 %v906_v7, %v1983_v18  ;;  %v1986_v15 = vpop.f32.mrb[29].mxu0 }
 0x32a   :  { %v925_v16 = vmax.f32 %v923_v30, %v1986_v15  ;;  %v873_v20 = vpop.f32.mrb[30].mxu0 }
 0x32b   :  { %v909_v22 = vmax.f32 %v907_v17, %v873_v20  ;;  %v1989_v55 = vpop.f32.mrb[31].mxu0 }
 0x32c   :  { %v926_v57 = vmax.f32 %v924_v44, %v1989_v55 }
 0x330   :  { %v879_v63 = vpop.f32.mrb[32].mxu0 }
 0x331   :  { %v910_v8 = vmax.f32 %v908_v19, %v879_v63  ;;  %v1992_v14 = vpop.f32.mrb[33].mxu0 }
 0x332   :  { %v927_v24 = vmax.f32 %v925_v16, %v1992_v14  ;;  %v883_v59 = vpop.f32.mrb[34].mxu0 }
 0x333   :  { %v911_v12 = vmax.f32 %v909_v22, %v883_v59  ;;  %v1995_v13 = vpop.f32.mrb[35].mxu0 }
 0x334   :  { %v928_v38 = vmax.f32 %v926_v57, %v1995_v13 }
 0x338   :  { %v889_v54 = vpop.f32.mrb[36].mxu0 }
 0x339   :  { %v912_v51 = vmax.f32 %v910_v8, %v889_v54  ;;  %v1998_v34 = vpop.f32.mrb[37].mxu0 }
 0x33a   :  { %v929_v4 = vmax.f32 %v927_v24, %v1998_v34  ;;  %v893_v23 = vpop.f32.mrb[38].mxu0 }
 0x33b   :  { %v913_v35 = vmax.f32 %v911_v12, %v893_v23  ;;  %v2001_v31 = vpop.f32.mrb[39].mxu0 }
 0x33c   :  { %v930_v32 = vmax.f32 %v928_v38, %v2001_v31 }
 0x340   :  { %v899_v52 = vpop.f32.mrb[40].mxu0 }
 0x341   :  { %v914_v45 = vsel %vm297_vm1, %v899_v52, -inf  ;;  %v2005_v37 = vpop.f32.mrb[41].mxu0 }
 0x342   :  { %v915_v33 = vmax.f32 %v912_v51, %v914_v45  ;;  %v931_v56 = vsel %vm297_vm1, %v2005_v37, -inf  ;;  %v903_v40 = vpop.f32.mrb[42].mxu0 }
 0x343   :  { %v932_v42 = vmax.f32 %v929_v4, %v931_v56  ;;  %v904_v47 = vpop.f32.mrb[43].mxu0 }
 0x344   :  { %v916_v0 = vmax.f32 %v915_v33, %v913_v35 }
 0x345   :  { %v933_v2 = vmax.f32 %v932_v42, %v930_v32 }
 0x346   :  { %v917_v61 = vrot.slane %v916_v0, 4 }
 0x347   :  { %v934_v43 = vrot.slane %v933_v2, 4 }
 0x348   :  { %v918_v28 = vmax.f32 %v916_v0, %v917_v61 }
 0x349   :  { %v935_v5 = vmax.f32 %v933_v2, %v934_v43 }
 0x34a   :  { %v919_v49 = vrot.slane %v918_v28, 2 }
 0x34b   :  { %v936_v53 = vrot.slane %v935_v5, 2 }
 0x34c   :  { %v920_v50 = vmax.f32 %v918_v28, %v919_v49 }
 0x34d   :  { %v937_v1 = vmax.f32 %v935_v5, %v936_v53 }
 0x34e   :  { %v921_v36 = vrot.slane %v920_v50, 1 }
 0x34f   :  { %v938_v60 = vrot.slane %v937_v1, 1 }
 0x350   :  { %v922_v7 = vmax.f32 %v920_v50, %v921_v36 }
 0x351   :  { %v2009_v30 = vmax.f32 %v937_v1, %v938_v60 }
 0x352   :  { %v940_v17 = vsub.f32 %v1959_v6, %v922_v7  ;;  %v942_v44 = vsub.f32 %v1963_v48, %v922_v7  ;;  %v944_v19 = vsub.f32 %v1967_v39, %v922_v7  ;;  %v946_v16 = vsub.f32 %v1975_v25, %v922_v7 }
 0x353   :  { %v948_v22 = vsub.f32 %v1983_v18, %v922_v7  ;;  %v950_v57 = vsub.f32 %v873_v20, %v922_v7  ;;  %v952_v8 = vsub.f32 %v879_v63, %v922_v7  ;;  %v954_v24 = vsub.f32 %v883_v59, %v922_v7 }
 0x354   :  { %v956_v12 = vsub.f32 %v889_v54, %v922_v7  ;;  %v958_v38 = vsub.f32 %v893_v23, %v922_v7  ;;  %v960_v51 = vsub.f32 %v899_v52, %v922_v7  ;;  %v962_v4 = vmul.f32 1.442695, %v940_v17 }
 0x355   :  { %v966_v35 = vmul.f32 1.442695, %v942_v44  ;;  %v970_v32 = vmul.f32 1.442695, %v944_v19  ;;  %v974_v45 = vmul.f32 1.442695, %v946_v16  ;;  %v941_v6 = vsub.f32 %v1961_v10, %v2009_v30 }
 0x356   :  { %1439 = vpow2.f32 %v962_v4  ;;  %v978_v48 = vmul.f32 1.442695, %v948_v22  ;;  %v982_v39 = vmul.f32 1.442695, %v950_v57  ;;  %v986_v25 = vmul.f32 1.442695, %v952_v8 }
 0x357   :  { %1441 = vpow2.f32 %v966_v35  ;;  %v990_v33 = vmul.f32 1.442695, %v954_v24  ;;  %v994_v18 = vmul.f32 1.442695, %v956_v12  ;;  %v943_v20 = vsub.f32 %v1965_v11, %v2009_v30 }
 0x358   :  { %1443 = vpow2.f32 %v970_v32  ;;  %v945_v63 = vsub.f32 %v1971_v21, %v2009_v30  ;;  %v947_v59 = vsub.f32 %v1979_v26, %v2009_v30  ;;  %v949_v10 = vsub.f32 %v1986_v15, %v2009_v30 }
 0x359   :  { %1445 = vpow2.f32 %v974_v45  ;;  %v951_v54 = vsub.f32 %v1989_v55, %v2009_v30  ;;  %v953_v23 = vsub.f32 %v1992_v14, %v2009_v30  ;;  %v955_v11 = vsub.f32 %v1995_v13, %v2009_v30 }
 0x35a   :  { %1447 = vpow2.f32 %v978_v48  ;;  %v957_v21 = vsub.f32 %v1998_v34, %v2009_v30  ;;  %v998_v52 = vmul.f32 1.442695, %v958_v38  ;;  %v959_v26 = vsub.f32 %v2001_v31, %v2009_v30 }
 0x35b   :  { %1449 = vpow2.f32 %v982_v39  ;;  %v961_v15 = vsub.f32 %v2005_v37, %v2009_v30  ;;  %v1002_v55 = vmul.f32 1.442695, %v960_v51  ;;  %v964_v56 = vmul.f32 1.442695, %v941_v6 }
 0x35c   :  { %1451 = vpow2.f32 %v986_v25  ;;  %v968_v14 = vmul.f32 1.442695, %v943_v20  ;;  %v972_v40 = vmul.f32 1.442695, %v945_v63  ;;  %v976_v42 = vmul.f32 1.442695, %v947_v59 }
 0x35d   :  { %1453 = vpow2.f32 %v990_v33  ;;  %v980_v47 = vmul.f32 1.442695, %v949_v10  ;;  %v984_v31 = vmul.f32 1.442695, %v951_v54  ;;  %v988_v43 = vmul.f32 1.442695, %v953_v23 }
 0x35e   :  { %1455 = vpow2.f32 %v994_v18  ;;  %v992_v49 = vmul.f32 1.442695, %v955_v11  ;;  %v996_v1 = vmul.f32 1.442695, %v957_v21  ;;  %v1000_v7 = vmul.f32 1.442695, %v959_v26 }
 0x35f   :  { %1457 = vpow2.f32 %v998_v52  ;;  %v1004_v24 = vmul.f32 1.442695, %v961_v15 }
 0x360   :  { %v1440_v13 = vpop.eup %1439  ;;  %1459 = vpow2.f32 %v1002_v55 }
 0x361   :  { %v1442_v34 = vpop.eup %1441  ;;  %1461 = vpow2.f32 %v964_v56 }
 0x362   :  { %v1444_v0 = vpop.eup %1443  ;;  %v1006_v2 = vadd.f32 %v1442_v34, %v1440_v13  ;;  %1463 = vpow2.f32 %v968_v14  ;;  %v1154_v61 = vpack.c.bf16 %v1442_v34, %v1440_v13 }
 0x363   :  { %v1446_v37 = vpop.eup %1445  ;;  %1465 = vpow2.f32 %v972_v40 }
 0x364   :  { %v1448_v28 = vpop.eup %1447  ;;  %v1007_v5 = vadd.f32 %v1444_v0, %v1006_v2  ;;  %1467 = vpow2.f32 %v976_v42  ;;  %v1156_v53 = vpack.c.bf16 %v1446_v37, %v1444_v0 }
 0x365   :  { %v1450_v50 = vpop.eup %1449  ;;  %1469 = vpow2.f32 %v980_v47 }
 0x366   :  { %v1452_v36 = vpop.eup %1451  ;;  %v1008_v60 = vadd.f32 %v1446_v37, %v1007_v5  ;;  %1471 = vpow2.f32 %v984_v31  ;;  %v1158_v30 = vpack.c.bf16 %v1450_v50, %v1448_v28 }
 0x367   :  { %v1454_v17 = vpop.eup %1453  ;;  %1473 = vpow2.f32 %v988_v43 }
 0x368   :  { %v1456_v44 = vpop.eup %1455  ;;  %v1009_v19 = vadd.f32 %v1448_v28, %v1008_v60  ;;  %1475 = vpow2.f32 %v992_v49  ;;  %v1160_v16 = vpack.c.bf16 %v1454_v17, %v1452_v36 }
 0x369   :  { %v1458_v22 = vpop.eup %1457  ;;  %1477 = vpow2.f32 %v996_v1 }
 0x36a   :  { %v1460_v57 = vpop.eup %1459  ;;  %v1010_v8 = vadd.f32 %v1450_v50, %v1009_v19  ;;  %1479 = vpow2.f32 %v1000_v7  ;;  %v1162_v12 = vpack.c.bf16 %v1458_v22, %v1456_v44 }
 0x36b   :  { %v1462_v38 = vpop.eup %1461  ;;  %1481 = vpow2.f32 %v1004_v24  ;;  %v1015_v21 = vsel %vm297_vm1, %v1460_v57, 0.0  ;;  %v1164_v31 = vpack.c.bf16 %v1460_v57, %v1460_v57  ;;  %v1488_v57 = vld [vmem:[%s2099_s0 + $0x48] sm:$0xff] }
 0x36c   :  { %v1464_v51 = vpop.eup %1463  ;;  %v1011_v4 = vadd.f32 %v1452_v36, %v1010_v8 }
 0x36d   :  { %v1466_v35 = vpop.eup %1465  ;;  %v1023_v32 = vadd.f32 %v1464_v51, %v1462_v38  ;;  %v1155_v45 = vpack.c.bf16 %v1464_v51, %v1462_v38  ;;  %v1173_v43 = vand.u32 %v1164_v31, %v1871_v41  ;;  %v1490_v51 = vld [vmem:[%s2099_s0 + $0x58] sm:$0xff] }
 0x36e   :  { %v1468_v6 = vpop.eup %1467  ;;  %v1012_v48 = vadd.f32 %v1454_v17, %v1011_v4 }
 0x36f   :  { %v1470_v39 = vpop.eup %1469  ;;  %v1024_v25 = vadd.f32 %v1466_v35, %v1023_v32  ;;  %1178 = vmatprep.subr.bf16.mxu1 %v1155_v45  ;;  %v1157_v33 = vpack.c.bf16 %v1468_v6, %v1466_v35 }
 0x370   :  { %v1472_v18 = vpop.eup %1471  ;;  %v1013_v20 = vadd.f32 %v1456_v44, %v1012_v48  ;;  %1179 = vmatpush1.bf16.msra.mxu1 %v1154_v61  ;;  %v1487_v44 = vld [vmem:[%s2099_s0 + $0x40] sm:$0xff] }
 0x371   :  { %v1474_v63 = vpop.eup %1473  ;;  %v1025_v59 = vadd.f32 %v1468_v6, %v1024_v25  ;;  %1180 = vmatprep.subr.bf16.mxu1 %v1157_v33  ;;  %v1159_v10 = vpack.c.bf16 %v1472_v18, %v1470_v39 }
 0x372   :  { %v1476_v54 = vpop.eup %1475  ;;  %v1014_v23 = vadd.f32 %v1458_v22, %v1013_v20  ;;  %v1492_v20 = vld [vmem:[%s2099_s0 + $0x68] sm:$0xff] }
 0x373   :  { %v1478_v11 = vpop.eup %1477  ;;  %v1026_v52 = vadd.f32 %v1470_v39, %v1025_v59  ;;  %v1161_v26 = vpack.c.bf16 %v1476_v54, %v1474_v63  ;;  %v1491_v39 = vld [vmem:[%s2099_s0 + $0x60] sm:$0xff] }
 0x374   :  { %v1480_v15 = vpop.eup %1479  ;;  %v1016_v55 = vadd.f32 %v1015_v21, %v1014_v23  ;;  %1181 = vmatpush1.bf16.msra.mxu1 %v1156_v53  ;;  %v1494_v23 = vld [vmem:[%s2099_s0 + $0x78] sm:$0xff] }
 0x375   :  { %v1027_v56 = vadd.f32 %v1472_v18, %v1026_v52  ;;  %1182 = vmatprep.subr.bf16.mxu1 %v1159_v10  ;;  %v1163_v14 = vpack.c.bf16 %v1480_v15, %v1478_v11  ;;  %v1482_v13 = vpop.eup %1481  ;;  %v1493_v10 = vld [vmem:[%s2099_s0 + $0x70] sm:$0xff] }
 0x376   :  { %v1165_v47 = vpack.c.bf16 %v1482_v13, %v1482_v13  ;;  %v1032_v2 = vsel %vm297_vm1, %v1482_v13, 0.0  ;;  %v1017_v28 = vrot.slane %v1016_v55, 4 }
 0x377   :  { %v1028_v40 = vadd.f32 %v1474_v63, %v1027_v56 }
 0x378   :  { %1183 = vmatpush1.bf16.msra.mxu1 %v1158_v30  ;;  %v1176_v37 = vand.u32 %v1165_v47, %v1871_v41  ;;  %v1018_v49 = vadd.f32 %v1017_v28, %v1016_v55 }
 0x379   :  { %v1029_v42 = vadd.f32 %v1476_v54, %v1028_v40  ;;  %1184 = vmatprep.subr.bf16.mxu1 %v1161_v26 }
 0x37a   :  { %v1019_v50 = vrot.slane %v1018_v49, 2 }
 0x37b   :  { %v1030_v34 = vadd.f32 %v1478_v11, %v1029_v42 }
 0x37c   :  { %1185 = vmatpush1.bf16.msra.mxu1 %v1160_v16  ;;  %v1020_v41 = vadd.f32 %v1019_v50, %v1018_v49 }
 0x37d   :  { %v1031_v0 = vadd.f32 %v1480_v15, %v1030_v34  ;;  %1186 = vmatprep.subr.bf16.mxu1 %v1163_v14 }
 0x37e   :  { %v1021_v60 = vrot.slane %v1020_v41, 1 }
 0x37f   :  { %v1033_v61 = vadd.f32 %v1032_v2, %v1031_v0 }
 0x380   :  { %1187 = vmatpush1.bf16.msra.mxu1 %v1162_v12  ;;  %v1022_v27 = vadd.f32 %v1021_v60, %v1020_v41  ;;  %v1489_v12 = vld [vmem:[%s2099_s0 + $0x50] sm:$0xff] }
 0x381   :  { %1188 = vmatprep.subr.bf16.mxu1 %v1176_v37  ;;  %v1034_v5 = vrot.slane %v1033_v61, 4 }
 0x382   :  { %1483 = vrcp.f32 %v1022_v27 }
 0x383   :  { %v1035_v53 = vadd.f32 %v1034_v5, %v1033_v61 }
 0x384   :  { %1189 = vmatpush1.bf16.msra.mxu1 %v1173_v43 }
 0x385   :  { %v1036_v1 = vrot.slane %v1035_v53, 2 }
 0x387   :  { %1329 = vmatmul.mubr.msk.bf16.vlgmr.msra.gmra.mrb[36].mxu1 %vm549_vm4, %v1152_v9  ;;  %v1037_v36 = vadd.f32 %v1036_v1, %v1035_v53 }
 0x388   :  { %1220 = vmatprep.mubr.bf16.mxu1 %v1495_v3 }
 0x389   :  { %v1038_v7 = vrot.slane %v1037_v36, 1 }
 0x38b   :  { %v1039_v29 = vadd.f32 %v1038_v7, %v1037_v36 }
 0x38c   :  { %v1484_v3 = vpop.eup %1483 }
 0x38d   :  { %1485 = vrcp.f32 %v1039_v29 }
 0x38f   :  { %1330 = vmatmul.mubr.msk.bf16.gmra.mrb[40].mxu1 %vm549_vm4, %v1153_v62 }
 0x397   :  { %v1486_v30 = vpop.eup %1485 }
 0x45a   :  { %v1212_v9 = vpop.f32.mrb[36].mxu1 }
 0x45b   :  { %v1231_v46 = vmul.f32 %v1484_v3, %v1212_v9  ;;  %v1214_v58 = vpop.f32.mrb[37].mxu1 }
 0x45c   :  { %v1232_v62 = vmul.f32 %v1486_v30, %v1214_v58  ;;  %v1216_v17 = vpop.f32.mrb[38].mxu1 }
 0x45d   :  { %v1239_v19 = vadd.f32 %v1487_v44, %v1231_v46  ;;  %v1233_v16 = vmul.f32 %v1484_v3, %v1216_v17  ;;  %v1218_v22 = vpop.f32.mrb[39].mxu1 }
 0x45e   :  { %v1240_v8 = vadd.f32 %v1488_v57, %v1232_v62  ;;  %v1234_v24 = vmul.f32 %v1486_v30, %v1218_v22 }
 0x45f   :  { %1331 = vst [vmem:[%s2106_s7 + $0x40] sm:$0xff] %v1239_v19  ;;  %v1241_v38 = vadd.f32 %v1489_v12, %v1233_v16 }
 0x460   :  { %1332 = vst [vmem:[%s2106_s7 + $0x48] sm:$0xff] %v1240_v8  ;;  %v1242_v4 = vadd.f32 %v1490_v51, %v1234_v24 }
 0x461   :  { %1333 = vst [vmem:[%s2106_s7 + $0x50] sm:$0xff] %v1241_v38 }
 0x462   :  { %1334 = vst [vmem:[%s2106_s7 + $0x58] sm:$0xff] %v1242_v4  ;;  %v1222_v35 = vpop.f32.mrb[40].mxu1 }
 0x463   :  { %v1235_v32 = vmul.f32 %v1484_v3, %v1222_v35  ;;  %v1224_v45 = vpop.f32.mrb[41].mxu1 }
 0x464   :  { %v1236_v6 = vmul.f32 %v1486_v30, %v1224_v45  ;;  %v1226_v48 = vpop.f32.mrb[42].mxu1 }
 0x465   :  { %v1243_v25 = vadd.f32 %v1491_v39, %v1235_v32  ;;  %v1237_v33 = vmul.f32 %v1484_v3, %v1226_v48  ;;  %v1228_v18 = vpop.f32.mrb[43].mxu1 }
 0x466   :  { %v1244_v63 = vadd.f32 %v1492_v20, %v1236_v6  ;;  %v1238_v59 = vmul.f32 %v1486_v30, %v1228_v18 }
 0x467   :  { %1335 = vst [vmem:[%s2106_s7 + $0x60] sm:$0xff] %v1243_v25  ;;  %v1245_v54 = vadd.f32 %v1493_v10, %v1237_v33 }
 0x468   :  { %1336 = vst [vmem:[%s2106_s7 + $0x68] sm:$0xff] %v1244_v63  ;;  %v1246_v11 = vadd.f32 %v1494_v23, %v1238_v59 }
 0x469   :  { %1337 = vst [vmem:[%s2106_s7 + $0x70] sm:$0xff] %v1245_v54 }
 0x46a   :  { %1338 = vst [vmem:[%s2106_s7 + $0x78] sm:$0xff] %v1246_v11 }

</bundles_post_ra>
